<compile_context>
chip_gen: v7x
topology: tpu7x:2x2x1
jax: 0.10.0
libtpu: 0.0.40
codegen_flags: <defaults>
</compile_context>

<pallas_src>
import functools

import jax
import jax.numpy as jnp
from jax.experimental import pallas as pl
from jax.experimental.pallas import tpu as pltpu


_MIB = 1024 * 1024


def _round_up(x, m):
    return (x + m - 1) // m * m


def _cdiv(a, b):
    return (a + b - 1) // b


def _device_kind():
    try:
        return jax.devices()[0].device_kind.lower()
    except Exception:
        return ""


def _vmem_capacity_bytes():
    try:
        cap = int(pltpu.get_tpu_info().vmem_capacity_bytes)
        if cap > 0:
            return cap
    except Exception:
        pass
    return 64 * _MIB  # conservative default (v7x per-TC VMEM)


def _cores_per_chip():
    kind = _device_kind()
    # v4 / v5p megacore and v7x expose 2 TensorCores that a "parallel" grid
    # axis is sharded across; v5e / v6e have one.
    if "v4" in kind or "v5p" in kind or "7" in kind:
        return 2
    return 1


def _bf16_vpu():
    kind = _device_kind()
    # v5e ("v5 lite") has no bf16 VALUs -> keep the bias+ReLU epilogue in f32.
    if "v5 lite" in kind or "v5e" in kind or "v5lite" in kind:
        return False
    return True


def ffn_kernel(x_ref, w1_ref, b1_ref, w2_ref, b2_ref, gamma_ref, beta_ref,
               o_ref, acc_ref, *, d_in, d_in_p, bf16_epilogue):
    k = pl.program_id(1)

    @pl.when(k == 0)
    def _init():
        acc_ref[...] = jnp.zeros_like(acc_ref)

    x = x_ref[...]                      # (tm, d_in_p), zero-padded lanes
    xb = x.astype(jnp.bfloat16)

    # First matmul chunk on the MXU: (tm, d_in_p) @ (d_in_p, tk), f32 acc.
    h = jnp.dot(xb, w1_ref[...], preferred_element_type=jnp.float32)
    if bf16_epilogue:
        # bf16 bias+ReLU epilogue (v6e/v7x bf16 VALUs); operand is cast to
        # bf16 for the second matmul anyway, so accuracy impact is negligible.
        h = jnp.maximum(h.astype(jnp.bfloat16) + b1_ref[...], 0.0)
    else:
        h = jnp.maximum(h + b1_ref[...], 0.0).astype(jnp.bfloat16)

    # Second matmul chunk, accumulated into the f32 scratch.
    acc_ref[...] += jnp.dot(h, w2_ref[...], preferred_element_type=jnp.float32)

    @pl.when(k == pl.num_programs(1) - 1)
    def _epilogue():
        # bias + dropout(identity, inference) + residual, in f32.
        y = acc_ref[...] + b2_ref[...] + x.astype(jnp.float32)

        # Two-pass LayerNorm over the real d_in lanes.  Padded lanes of y are
        # exactly zero (x, W2 cols, b2 zero-padded), so the mean sum is exact;
        # the centered pass masks padded lanes so they contribute nothing.
        inv_d = 1.0 / d_in
        mean = jnp.sum(y, axis=-1, keepdims=True) * inv_d
        if d_in_p == d_in:
            diff = y - mean
        else:
            lane = jax.lax.broadcasted_iota(jnp.int32, (1, d_in_p), 1)
            mask = (lane < d_in).astype(jnp.float32)
            diff = y - mean * mask      # padded lanes stay exactly zero
        var = jnp.sum(diff * diff, axis=-1, keepdims=True) * inv_d
        inv = jax.lax.rsqrt(var + 1e-6)
        o_ref[...] = (diff * inv * gamma_ref[...] + beta_ref[...]).astype(o_ref.dtype)


def make_positionwise_ff(w1, b1, w2, b2, gamma, beta, *, tm=None):
    """Build the FFN forward.  w1: (d_in, d_hid) == torch w_1.weight.T,
    w2: (d_hid, d_in) == torch w_2.weight.T.  Parameter padding and the bf16
    cast happen ONCE here, not per forward call."""
    d_in, d_hid = w1.shape
    assert w2.shape == (d_hid, d_in)

    bf16_epilogue = _bf16_vpu()
    cores = _cores_per_chip()
    vmem_cap = _vmem_capacity_bytes()
    budget = int(vmem_cap * 0.8)        # headroom for compiler scratch

    # Lane-dense padding (multiples of 128 lanes).
    d_in_p = _round_up(d_in, 128)
    d_hid_p = _round_up(d_hid, 128)

    # ---- choose the hidden-dim chunk tk ------------------------------------
    # Keep the whole bf16 weights resident (single-buffered) when they fit in
    # ~half the budget; otherwise stream double-buffered d_hid chunks.
    full_w_bytes = 2 * 2 * d_in_p * d_hid_p          # W1 + W2, bf16, 1 buffer
    if full_w_bytes <= budget // 2:
        tk = d_hid_p
    else:
        bytes_per_tk_col = 2 * 2 * 2 * d_in_p        # W1+W2 chunk cols, bf16, 2 bufs
        tk = (budget // 2) // bytes_per_tk_col
        tk = max(128, tk // 128 * 128)
        tk = min(tk, d_hid_p)
        d_hid_p = _round_up(d_hid_p, tk)
    nk = d_hid_p // tk

    if nk == 1:
        w_resident = full_w_bytes + 4 * d_hid_p + 3 * 4 * d_in_p
    else:
        w_resident = (2 * 2 * 2 * d_in_p * tk        # W1/W2 chunks, 2 buffers
                      + 2 * 4 * tk                   # b1 chunk, 2 buffers
                      + 3 * 4 * d_in_p)              # b2/gamma/beta, 1 buffer

    # ---- one-time parameter padding / casting ------------------------------
    b1_dtype = jnp.bfloat16 if bf16_epilogue else jnp.float32
    w1p = jnp.pad(jnp.asarray(w1, jnp.float32),
                  ((0, d_in_p - d_in), (0, d_hid_p - d_hid))).astype(jnp.bfloat16)
    w2p = jnp.pad(jnp.asarray(w2, jnp.float32),
                  ((0, d_hid_p - d_hid), (0, d_in_p - d_in))).astype(jnp.bfloat16)
    b1p = jnp.pad(jnp.asarray(b1, jnp.float32),
                  (0, d_hid_p - d_hid)).reshape(1, d_hid_p).astype(b1_dtype)
    b2p = jnp.pad(jnp.asarray(b2, jnp.float32),
                  (0, d_in_p - d_in)).reshape(1, d_in_p)
    gp = jnp.pad(jnp.asarray(gamma, jnp.float32),
                 (0, d_in_p - d_in)).reshape(1, d_in_p)
    bp = jnp.pad(jnp.asarray(beta, jnp.float32),
                 (0, d_in_p - d_in)).reshape(1, d_in_p)
    params = (w1p, b1p, w2p, b2p, gp, bp)

    # Per-row VMEM cost (bytes) as a function of tm.
    per_row = ((2 + 2) * 4 * d_in_p                  # x + out tiles, 2 buffers each
               + 4 * d_in_p                          # f32 accumulator scratch
               + 4 * 4 * d_in_p                      # f32 temporaries (y, diff, ...)
               + 2 * d_in_p                          # bf16 copy of x
               + (2 if bf16_epilogue else 6) * tk)   # h chunk

    const_mode = dict(pipeline_mode=pl.Buffered(1))
    w_mode = const_mode if nk == 1 else {}           # chunked weights need 2 buffers

    def forward(x):
        B, S, xd = x.shape
        assert xd == d_in
        n_rows = B * S

        # ---- pick the row tile tm ------------------------------------------
        tm_cap = max(16, (budget - w_resident) // per_row // 16 * 16)
        tm_default = tm if tm is not None else (
            1024 if vmem_cap >= 96 * _MIB else 512)
        tm_eff = min(tm_default, tm_cap, _round_up(n_rows, 16))
        tm_eff = max(16, tm_eff // 16 * 16)
        # Ensure every TensorCore gets >= 2 row steps on multi-core chips.
        if cores > 1 and n_rows > tm_eff:
            step_cap = _round_up(_cdiv(n_rows, 2 * cores), 16)
            if step_cap >= 128:
                tm_eff = min(tm_eff, step_cap)

        n_rows_p = _round_up(n_rows, tm_eff)

        # Pad activations only when actually needed (skip the extra HBM pass
        # when d_in % 128 == 0 and n_rows % tm == 0).
        x2 = x.reshape(n_rows, d_in)
        needs_pad = (n_rows_p != n_rows) or (d_in_p != d_in)
        if needs_pad:
            x2 = jnp.pad(x2, ((0, n_rows_p - n_rows), (0, d_in_p - d_in)))

        est = w_resident + tm_eff * per_row
        vmem_limit = int(min(vmem_cap - 2 * _MIB, max(32 * _MIB, est * 3 // 2)))

        in_specs = [
            pl.BlockSpec((tm_eff, d_in_p), lambda i, k: (i, 0)),            # x tile
            pl.BlockSpec((d_in_p, tk), lambda i, k: (0, k), **w_mode),      # W1 chunk
            pl.BlockSpec((1, tk), lambda i, k: (0, k), **w_mode),           # b1 chunk
            pl.BlockSpec((tk, d_in_p), lambda i, k: (k, 0), **w_mode),      # W2 chunk
            pl.BlockSpec((1, d_in_p), lambda i, k: (0, 0), **const_mode),   # b2
            pl.BlockSpec((1, d_in_p), lambda i, k: (0, 0), **const_mode),   # gamma
            pl.BlockSpec((1, d_in_p), lambda i, k: (0, 0), **const_mode),   # beta
        ]

        out2 = pl.pallas_call(
            functools.partial(ffn_kernel, d_in=d_in, d_in_p=d_in_p,
                              bf16_epilogue=bf16_epilogue),
            out_shape=jax.ShapeDtypeStruct((n_rows_p, d_in_p), x.dtype),
            grid_spec=pltpu.PrefetchScalarGridSpec(
                num_scalar_prefetch=0,
                grid=(n_rows_p // tm_eff, nk),
                in_specs=in_specs,
                out_specs=pl.BlockSpec((tm_eff, d_in_p), lambda i, k: (i, 0)),
                scratch_shapes=[pltpu.VMEM((tm_eff, d_in_p), jnp.float32)],
            ),
            compiler_params=pltpu.CompilerParams(
                dimension_semantics=("parallel", "arbitrary"),
                vmem_limit_bytes=vmem_limit),
        )(x2, *params)

        if needs_pad:
            out2 = out2[:n_rows, :d_in]
        return out2.reshape(B, S, d_in)

    return forward


def reference_ff(x, w1, b1, w2, b2, gamma, beta):
    """Pure-JAX f32 reference of the PyTorch forward (inference)."""
    xf = x.astype(jnp.float32)
    h = jnp.maximum(xf @ w1 + b1, 0.0)
    y = h @ w2 + b2
    y = y + xf
    mean = jnp.mean(y, axis=-1, keepdims=True)
    var = jnp.mean((y - mean) ** 2, axis=-1, keepdims=True)
    return ((y - mean) / jnp.sqrt(var + 1e-6)) * gamma + beta


if __name__ == "__main__":
    # Small shapes consistent with the module: batch=2, seq=8, d_in=32, d_hid=64
    B, S, d_in, d_hid = 2, 8, 32, 64

    key = jax.random.PRNGKey(0)
    kx, k1, kb1, k2, kb2 = jax.random.split(key, 5)

    x = jax.random.normal(kx, (B, S, d_in), dtype=jnp.float32)

    # Deterministic parameter init (shapes from nn.Linear / nn.LayerNorm).
    # Stored pre-transposed: w1 (d_in, d_hid) == PyTorch w_1.weight.T, etc.
    w1 = jax.random.normal(k1, (d_in, d_hid), dtype=jnp.float32) * 0.05
    b1 = jax.random.normal(kb1, (d_hid,), dtype=jnp.float32) * 0.05
    w2 = jax.random.normal(k2, (d_hid, d_in), dtype=jnp.float32) * 0.05
    b2 = jax.random.normal(kb2, (d_in,), dtype=jnp.float32) * 0.05
    gamma = jnp.ones((d_in,), dtype=jnp.float32)   # LayerNorm weight
    beta = jnp.zeros((d_in,), dtype=jnp.float32)   # LayerNorm bias

    ff = make_positionwise_ff(w1, b1, w2, b2, gamma, beta)
    out = jax.block_until_ready(ff(x))

    ref = reference_ff(x, w1, b1, w2, b2, gamma, beta)
    assert out.shape == (B, S, d_in)
    # bf16 matmul operands (MXU-native) vs. the pure-f32 reference -> relaxed
    # tolerance; residual/LayerNorm are still f32 in-kernel.
    assert jnp.allclose(out, ref, atol=2e-2, rtol=2e-2), "mismatch vs reference"

    print("KERNEL_OK")
</pallas_src>

<mosaic_0001>
module attributes {stable_mosaic.version = 11 : i64} {
  func.func @ffn_kernel(%arg0: i32, %arg1: i32, %arg2: memref<16x128xf32, #tpu.memory_space<vmem>>, %arg3: memref<128x128xbf16, #tpu.memory_space<vmem>>, %arg4: memref<1x128xbf16, #tpu.memory_space<vmem>>, %arg5: memref<128x128xbf16, #tpu.memory_space<vmem>>, %arg6: memref<1x128xf32, #tpu.memory_space<vmem>>, %arg7: memref<1x128xf32, #tpu.memory_space<vmem>>, %arg8: memref<1x128xf32, #tpu.memory_space<vmem>>, %arg9: memref<16x128xf32, #tpu.memory_space<vmem>>, %arg10: memref<16x128xf32, #tpu.memory_space<vmem>>) attributes {dimension_semantics = [#tpu.dimension_semantics<parallel>, #tpu.dimension_semantics<arbitrary>], iteration_bounds = array<i64: 1, 1>, scalar_prefetch = 0 : i64, scratch_operands = 1 : i64, tpu.core_type = #tpu.core_type<tc>, window_params = [{transform_indices = @transform_0, window_bounds = array<i64: 16, 128>}, {pipeline_mode = #tpu.pipeline_mode<synchronous>, transform_indices = @transform_1, window_bounds = array<i64: 128, 128>}, {pipeline_mode = #tpu.pipeline_mode<synchronous>, transform_indices = @transform_2, window_bounds = array<i64: 1, 128>}, {pipeline_mode = #tpu.pipeline_mode<synchronous>, transform_indices = @transform_3, window_bounds = array<i64: 128, 128>}, {pipeline_mode = #tpu.pipeline_mode<synchronous>, transform_indices = @transform_4, window_bounds = array<i64: 1, 128>}, {pipeline_mode = #tpu.pipeline_mode<synchronous>, transform_indices = @transform_5, window_bounds = array<i64: 1, 128>}, {pipeline_mode = #tpu.pipeline_mode<synchronous>, transform_indices = @transform_6, window_bounds = array<i64: 1, 128>}, {transform_indices = @transform_7, window_bounds = array<i64: 16, 128>}]} {
    %c0_i32 = arith.constant 0 : i32
    %0 = arith.cmpi eq, %arg1, %c0_i32 : i32
    %1 = arith.extui %0 : i1 to i32
    %c0_i32_0 = arith.constant 0 : i32
    %2 = arith.cmpi ne, %1, %c0_i32_0 : i32
    scf.if %2 {
      %cst_16 = arith.constant 0.000000e+00 : f32
      %21 = vector.broadcast %cst_16 : f32 to vector<16x128xf32>
      %c0_17 = arith.constant 0 : index
      %c0_18 = arith.constant 0 : index
      %22 = vector.load %arg10[%c0_17, %c0_18] : memref<16x128xf32, #tpu.memory_space<vmem>>, vector<16x128xf32>
      tpu.vector_store %arg10[%c0_17, %c0_18], %21 {strides = array<i32>} : memref<16x128xf32, #tpu.memory_space<vmem>>, vector<16x128xf32>,
    } else {
    }
    %c0 = arith.constant 0 : index
    %c0_1 = arith.constant 0 : index
    %3 = vector.load %arg2[%c0, %c0_1] : memref<16x128xf32, #tpu.memory_space<vmem>>, vector<16x128xf32>
    %4 = arith.truncf %3 : vector<16x128xf32> to vector<16x128xbf16>
    %c0_2 = arith.constant 0 : index
    %c0_3 = arith.constant 0 : index
    %5 = vector.load %arg3[%c0_2, %c0_3] : memref<128x128xbf16, #tpu.memory_space<vmem>>, vector<128x128xbf16>
    %cst = arith.constant dense<0.000000e+00> : vector<16x128xf32>
    %6 = tpu.matmul %4, %5, %cst {dimension_numbers = #tpu.dot_dimension_numbers<[1], [0], [0], [1], [0, 0, 1, 1], [], []>} : vector<16x128xbf16>, vector<128x128xbf16>, vector<16x128xf32> -> vector<16x128xf32>
    %7 = arith.truncf %6 : vector<16x128xf32> to vector<16x128xbf16>
    %c0_4 = arith.constant 0 : index
    %c0_5 = arith.constant 0 : index
    %8 = vector.load %arg4[%c0_4, %c0_5] : memref<1x128xbf16, #tpu.memory_space<vmem>>, vector<1x128xbf16>
    %9 = vector.broadcast %8 : vector<1x128xbf16> to vector<16x128xbf16>
    %10 = arith.addf %7, %9 : vector<16x128xbf16>
    %cst_6 = arith.constant 0.000000e+00 : bf16
    %11 = vector.broadcast %cst_6 : bf16 to vector<16x128xbf16>
    %12 = arith.maximumf %10, %11 : vector<16x128xbf16>
    %c0_7 = arith.constant 0 : index
    %c0_8 = arith.constant 0 : index
    %13 = vector.load %arg10[%c0_7, %c0_8] : memref<16x128xf32, #tpu.memory_space<vmem>>, vector<16x128xf32>
    %c0_9 = arith.constant 0 : index
    %c0_10 = arith.constant 0 : index
    %14 = vector.load %arg5[%c0_9, %c0_10] : memref<128x128xbf16, #tpu.memory_space<vmem>>, vector<128x128xbf16>
    %cst_11 = arith.constant dense<0.000000e+00> : vector<16x128xf32>
    %15 = tpu.matmul %12, %14, %cst_11 {dimension_numbers = #tpu.dot_dimension_numbers<[1], [0], [0], [1], [0, 0, 1, 1], [], []>} : vector<16x128xbf16>, vector<128x128xbf16>, vector<16x128xf32> -> vector<16x128xf32>
    %16 = arith.addf %13, %15 : vector<16x128xf32>
    %c0_12 = arith.constant 0 : index
    %c0_13 = arith.constant 0 : index
    %17 = vector.load %arg10[%c0_12, %c0_13] : memref<16x128xf32, #tpu.memory_space<vmem>>, vector<16x128xf32>
    tpu.vector_store %arg10[%c0_12, %c0_13], %16 {strides = array<i32>} : memref<16x128xf32, #tpu.memory_space<vmem>>, vector<16x128xf32>,
    %c0_i32_14 = arith.constant 0 : i32
    %18 = arith.cmpi eq, %arg1, %c0_i32_14 : i32
    %19 = arith.extui %18 : i1 to i32
    %c0_i32_15 = arith.constant 0 : i32
    %20 = arith.cmpi ne, %19, %c0_i32_15 : i32
    scf.if %20 {
      %c0_16 = arith.constant 0 : index
      %c0_17 = arith.constant 0 : index
      %21 = vector.load %arg10[%c0_16, %c0_17] : memref<16x128xf32, #tpu.memory_space<vmem>>, vector<16x128xf32>
      %c0_18 = arith.constant 0 : index
      %c0_19 = arith.constant 0 : index
      %22 = vector.load %arg6[%c0_18, %c0_19] : memref<1x128xf32, #tpu.memory_space<vmem>>, vector<1x128xf32>
      %23 = vector.broadcast %22 : vector<1x128xf32> to vector<16x128xf32>
      %24 = arith.addf %21, %23 : vector<16x128xf32>
      %25 = arith.addf %24, %3 : vector<16x128xf32>
      %cst_20 = arith.constant dense<0.000000e+00> : vector<16xf32>
      %26 = vector.multi_reduction <add>, %25, %cst_20 [1] : vector<16x128xf32> to vector<16xf32>
      %27 = vector.shape_cast %26 : vector<16xf32> to vector<16x1xf32>
      %cst_21 = arith.constant 3.125000e-02 : f32
      %28 = vector.broadcast %cst_21 : f32 to vector<16x1xf32>
      %29 = arith.mulf %27, %28 : vector<16x1xf32>
      %30 = tpu.iota {dimensions = array<i32: 1>} : vector<1x128xi32>
      %c32_i32 = arith.constant 32 : i32
      %31 = vector.broadcast %c32_i32 : i32 to vector<1x128xi32>
      %32 = arith.cmpi slt, %30, %31 : vector<1x128xi32>
      %33 = arith.extui %32 : vector<1x128xi1> to vector<1x128xi32>
      %34 = arith.sitofp %33 : vector<1x128xi32> to vector<1x128xf32>
      %35 = vector.broadcast %29 : vector<16x1xf32> to vector<16x128xf32>
      %36 = vector.broadcast %34 : vector<1x128xf32> to vector<16x128xf32>
      %37 = arith.mulf %35, %36 : vector<16x128xf32>
      %38 = arith.subf %25, %37 : vector<16x128xf32>
      %39 = arith.mulf %38, %38 : vector<16x128xf32>
      %cst_22 = arith.constant dense<0.000000e+00> : vector<16xf32>
      %40 = vector.multi_reduction <add>, %39, %cst_22 [1] : vector<16x128xf32> to vector<16xf32>
      %41 = vector.shape_cast %40 : vector<16xf32> to vector<16x1xf32>
      %cst_23 = arith.constant 3.125000e-02 : f32
      %42 = vector.broadcast %cst_23 : f32 to vector<16x1xf32>
      %43 = arith.mulf %41, %42 : vector<16x1xf32>
      %cst_24 = arith.constant 9.99999997E-7 : f32
      %44 = vector.broadcast %cst_24 : f32 to vector<16x1xf32>
      %45 = arith.addf %43, %44 : vector<16x1xf32>
      %46 = math.rsqrt %45 : vector<16x1xf32>
      %47 = vector.broadcast %46 : vector<16x1xf32> to vector<16x128xf32>
      %48 = arith.mulf %38, %47 : vector<16x128xf32>
      %c0_25 = arith.constant 0 : index
      %c0_26 = arith.constant 0 : index
      %49 = vector.load %arg7[%c0_25, %c0_26] : memref<1x128xf32, #tpu.memory_space<vmem>>, vector<1x128xf32>
      %50 = vector.broadcast %49 : vector<1x128xf32> to vector<16x128xf32>
      %51 = arith.mulf %48, %50 : vector<16x128xf32>
      %c0_27 = arith.constant 0 : index
      %c0_28 = arith.constant 0 : index
      %52 = vector.load %arg8[%c0_27, %c0_28] : memref<1x128xf32, #tpu.memory_space<vmem>>, vector<1x128xf32>
      %53 = vector.broadcast %52 : vector<1x128xf32> to vector<16x128xf32>
      %54 = arith.addf %51, %53 : vector<16x128xf32>
      %c0_29 = arith.constant 0 : index
      %c0_30 = arith.constant 0 : index
      %55 = vector.load %arg9[%c0_29, %c0_30] : memref<16x128xf32, #tpu.memory_space<vmem>>, vector<16x128xf32>
      tpu.vector_store %arg9[%c0_29, %c0_30], %54 {strides = array<i32>} : memref<16x128xf32, #tpu.memory_space<vmem>>, vector<16x128xf32>,
    } else {
    }
    return
  }
  func.func @transform_0(%arg0: i32, %arg1: i32) -> (i32, i32) {
    %c0_i32 = arith.constant 0 : i32
    %c0_i32_0 = arith.constant 0 : i32
    return %arg0, %c0_i32 : i32, i32
  }
  func.func @transform_1(%arg0: i32, %arg1: i32) -> (i32, i32) {
    %c0_i32 = arith.constant 0 : i32
    %c0_i32_0 = arith.constant 0 : i32
    return %c0_i32, %arg1 : i32, i32
  }
  func.func @transform_2(%arg0: i32, %arg1: i32) -> (i32, i32) {
    %c0_i32 = arith.constant 0 : i32
    %c0_i32_0 = arith.constant 0 : i32
    return %c0_i32, %arg1 : i32, i32
  }
  func.func @transform_3(%arg0: i32, %arg1: i32) -> (i32, i32) {
    %c0_i32 = arith.constant 0 : i32
    %c0_i32_0 = arith.constant 0 : i32
    return %arg1, %c0_i32 : i32, i32
  }
  func.func @transform_4(%arg0: i32, %arg1: i32) -> (i32, i32) {
    %c0_i32 = arith.constant 0 : i32
    %c0_i32_0 = arith.constant 0 : i32
    %c0_i32_1 = arith.constant 0 : i32
    return %c0_i32, %c0_i32_0 : i32, i32
  }
  func.func @transform_5(%arg0: i32, %arg1: i32) -> (i32, i32) {
    %c0_i32 = arith.constant 0 : i32
    %c0_i32_0 = arith.constant 0 : i32
    %c0_i32_1 = arith.constant 0 : i32
    return %c0_i32, %c0_i32_0 : i32, i32
  }
  func.func @transform_6(%arg0: i32, %arg1: i32) -> (i32, i32) {
    %c0_i32 = arith.constant 0 : i32
    %c0_i32_0 = arith.constant 0 : i32
    %c0_i32_1 = arith.constant 0 : i32
    return %c0_i32, %c0_i32_0 : i32, i32
  }
  func.func @transform_7(%arg0: i32, %arg1: i32) -> (i32, i32) {
    %c0_i32 = arith.constant 0 : i32
    %c0_i32_0 = arith.constant 0 : i32
    return %arg0, %c0_i32 : i32, i32
  }
}

</mosaic_0001>

<bundles_post_ra>
// kernel: tpu_custom_call.1
= control target key start
LH: loop header
LB: loop body
LE: loop exit
PB: predicated region body
PF: predicated region fallthrough
CT: control target
= control target key end

     0   :  { %12 = vsyncpa [#allocation4], 0  ;;  %s733_s0 = inlined_call_operand.hbm [shape: f32[16,128], index: 0, kind: input, shape index: {}]   ;;  %s734_s1 = inlined_call_operand.hbm [shape: bf16[128,128], index: 1, kind: input, shape index: {}]   ;;  %s735_s2 = inlined_call_operand.vmem [shape: bf16[1,128], index: 2, kind: input, shape index: {}]   ;;  %s736_s3 = inlined_call_operand.hbm [shape: bf16[128,128], index: 3, kind: input, shape index: {}]   ;;  %s737_s4 = inlined_call_operand.vmem [shape: f32[1,128], index: 4, kind: input, shape index: {}]   ;;  %s738_s5 = inlined_call_operand.vmem [shape: f32[1,128], index: 5, kind: input, shape index: {}]   ;;  %s739_s6 = inlined_call_operand.vmem [shape: f32[1,128], index: 6, kind: input, shape index: {}]   ;;  %s740_s7 = inlined_call_operand.hbm [shape: f32[16,128], index: 7, kind: output, shape index: {}]  }
   0x1   :  { %13 = vsyncpa [#allocation7], 0 }
   0x2   :  { %14 = vsyncpa [#allocation5], 0  ;;  %s591_s24 = smov [#allocation6]   ;;  %s497_s28 = scalar_lea.hbm %s734_s1, 1024 }
   0x3   :  { %s32_s25 = sshll.u32 %s591_s24, 4  ;;  %p498_p0 = scmp.ne.s32.totalorder %s734_s1, %s497_s28  ;;  %s33_s25 = int_to_ptr.vmem [resolvable:$true] %s32_s25 }
   0x4   :  { %p501_p1 = scmp.lt.u32.totalorder %s497_s28, %s734_s1 }
   0x6   :  { %p503_p2 = pnand %p501_p1, %p498_p0 }
   0x8   :  { %506 = shalt.err (!%p503_p2)
}
   0x9   :  { %s507_s10 = scalar_lea.vmem %s33_s25, 1024  ;;  %p512_p4 = scmp.lt.s32.totalorder %s33_s25, %s33_s25 }
   0xa   :  { %p508_p3 = scmp.ne.s32.totalorder %s33_s25, %s507_s10  ;;  %p513_p5 = scmp.lt.s32.totalorder %s507_s10, %s507_s10 }
   0xc   :  { %p514_p6 = por %p513_p5, %p512_p4 }
   0xe   :  { %p515_p7 = pnand %p514_p6, %p508_p3 }
  0x10   :  { %518 = shalt.err (!%p515_p7)
}
  0x11   :  { %s592_s11 = smov 64   ;;  %s593_s12 = smov 4  }
  0x12   :  { %38 = dma.hbm_to_vmem [thread:$0]  %s734_s1, 1024, %s33_s25, [#allocation7], %s592_s11, %s592_s11, %s593_s12  }
  0x13   :  { %s594_s15 = smov [#allocation3]   ;;  %s519_s19 = scalar_lea.hbm %s733_s0, 256 }
  0x14   :  { %s20_s16 = sshll.u32 %s594_s15, 4  ;;  %p520_p8 = scmp.ne.s32.totalorder %s733_s0, %s519_s19  ;;  %s21_s16 = int_to_ptr.vmem [resolvable:$true] %s20_s16 }
  0x15   :  { %p523_p9 = scmp.lt.u32.totalorder %s519_s19, %s733_s0 }
  0x17   :  { %p525_p10 = pnand %p523_p9, %p520_p8 }
  0x19   :  { %528 = shalt.err (!%p525_p10)
}
  0x1a   :  { %s529_s24 = scalar_lea.vmem %s21_s16, 256  ;;  %p534_p12 = scmp.lt.s32.totalorder %s21_s16, %s21_s16 }
  0x1b   :  { %p530_p11 = scmp.ne.s32.totalorder %s21_s16, %s529_s24  ;;  %p535_p13 = scmp.lt.s32.totalorder %s529_s24, %s529_s24 }
  0x1d   :  { %p536_p0 = por %p535_p13, %p534_p12 }
  0x1f   :  { %p537_p1 = pnand %p536_p0, %p530_p11 }
  0x21   :  { %540 = shalt.err (!%p537_p1)
}
  0x22   :  { %s595_s1 = smov 128   ;;  %s596_s25 = smov 8  }
  0x23   :  { %26 = dma.hbm_to_vmem [thread:$0]  %s733_s0, 256, %s21_s16, [#allocation4], %s595_s1, %s595_s1, %s596_s25  }
  0x24   :  { %s597_s28 = smov [#allocation8]   ;;  %s541_s9 = scalar_lea.hbm %s736_s3, 1024 }
  0x25   :  { %s46_s29 = sshll.u32 %s597_s28, 4  ;;  %p542_p2 = scmp.ne.s32.totalorder %s736_s3, %s541_s9  ;;  %s47_s29 = int_to_ptr.vmem [resolvable:$true] %s46_s29 }
  0x26   :  { %p545_p3 = scmp.lt.u32.totalorder %s541_s9, %s736_s3 }
  0x28   :  { %p547_p4 = pnand %p545_p3, %p542_p2 }
  0x2a   :  { %550 = shalt.err (!%p547_p4)
}
  0x2b   :  { %s551_s17 = scalar_lea.vmem %s47_s29, 1024  ;;  %p556_p6 = scmp.lt.s32.totalorder %s47_s29, %s47_s29 }
  0x2c   :  { %p552_p5 = scmp.ne.s32.totalorder %s47_s29, %s551_s17  ;;  %p557_p7 = scmp.lt.s32.totalorder %s551_s17, %s551_s17 }
  0x2e   :  { %p558_p8 = por %p557_p7, %p556_p6 }
  0x30   :  { %p559_p9 = pnand %p558_p8, %p552_p5 }
  0x32   :  { %562 = shalt.err (!%p559_p9)
}
  0x33   :  { %52 = dma.hbm_to_vmem [thread:$0]  %s736_s3, 1024, %s47_s29, [#allocation7], %s592_s11, %s592_s11, %s593_s12  }
  0x34   :  { %585 = dma.done.wait [#allocation4], 256  }
  0x35   :  { %586 = vsyncadd [#allocation4], 4294967040 }
  0x36   :  { %587 = dma.done.wait [#allocation7], 2048  }
  0x37   :  { %588 = vsyncadd [#allocation7], 4294965248  ;;  %v598_v0 = vmov 0.0   ;;  %vm599_vm0 = vmmov 0   ;;  %v477_v1 = vld [vmem:[#allocation6] sm:$0xff]   ;;  %v478_v2 = vld [vmem:[#allocation6 + $0x8] sm:$0xff]   ;;  %v188_v20 = vlaneseq }
  0x38   :  { %426 = vmatprep.subr.bf16.mxu0 %v598_v0  ;;  %442 = vmatprep.mubr.msk.bf16.mxu0 %vm599_vm0, %v598_v0  ;;  %v479_v3 = vld [vmem:[#allocation6 + $0x10] sm:$0xff]   ;;  %v485_v4 = vld [vmem:[#allocation8] sm:$0xff]   ;;  %v480_v5 = vld [vmem:[#allocation6 + $0x18] sm:$0xff]   ;;  %v600_v32 = vmov 0   ;;  %s601_s21 = smov [#allocation9]  }
  0x39   :  { %446 = vmatprep.subr.bf16.mxu1 %v598_v0  ;;  %462 = vmatprep.mubr.msk.bf16.mxu1 %vm599_vm0, %v598_v0  ;;  %v486_v6 = vld [vmem:[#allocation8 + $0x8] sm:$0xff]   ;;  %v481_v7 = vld [vmem:[#allocation6 + $0x20] sm:$0xff]   ;;  %v487_v8 = vld [vmem:[#allocation8 + $0x10] sm:$0xff]   ;;  %v189_v21 = vshrl.u32 %v188_v20, 7  ;;  %v328_v43 = vand.u32 127, %v188_v20  ;;  %s375_s22 = sshll.u32 %s601_s21, 4  ;;  %s376_s22 = int_to_ptr.vmem [resolvable:$true] %s375_s22 }
  0x3a   :  { %427 = vmatpush3.bf16.msra.mxu0 %v477_v1  ;;  %447 = vmatpush3.bf16.msra.mxu1 %v485_v4  ;;  %v482_v9 = vld [vmem:[#allocation6 + $0x28] sm:$0xff]   ;;  %v488_v10 = vld [vmem:[#allocation8 + $0x18] sm:$0xff]   ;;  %v483_v11 = vld [vmem:[#allocation6 + $0x30] sm:$0xff]   ;;  %s563_s23 = scalar_lea.vmem %s376_s22, 256  ;;  %p568_p11 = scmp.lt.s32.totalorder %s376_s22, %s376_s22 }
  0x3b   :  { %428 = vmatprep.subr.bf16.mxu0 %v598_v0  ;;  %448 = vmatprep.subr.bf16.mxu1 %v598_v0  ;;  %v489_v12 = vld [vmem:[#allocation8 + $0x20] sm:$0xff]   ;;  %v484_v13 = vld [vmem:[#allocation6 + $0x38] sm:$0xff]   ;;  %v75_v14 = vld [vmem:[#allocation3] sm:$0xff]  ;;  %v190_v24 = vsub.s32 0, %v189_v21  ;;  %vm329_vm1 = vcmp.lt.s32.totalorder %v328_v43, 32  ;;  %p564_p10 = scmp.ne.s32.totalorder %s376_s22, %s563_s23  ;;  %p569_p12 = scmp.lt.s32.totalorder %s563_s23, %s563_s23 }
  0x3c   :  { %v76_v15 = vld [vmem:[#allocation3 + $0x8] sm:$0xff]  ;;  %v490_v16 = vld [vmem:[#allocation8 + $0x28] sm:$0xff]   ;;  %v491_v18 = vld [vmem:[#allocation8 + $0x30] sm:$0xff]   ;;  %v405_v44 = vsel %vm329_vm1, 1.0, %v598_v0 }
  0x3d   :  { %v77_v17 = vpack.c.bf16 %v76_v15, %v75_v14  ;;  %v492_v19 = vld [vmem:[#allocation8 + $0x38] sm:$0xff]   ;;  %v184_v22 = vld [vmem:[%s735_s2] sm:$0x1]  ;;  %p570_p13 = por %p569_p12, %p568_p11 }
  0x3e   :  { %429 = vmatpush3.bf16.msra.mxu0 %v478_v2  ;;  %449 = vmatpush3.bf16.msra.mxu1 %v486_v6  ;;  %v186_v23 = vpack.i.b16 %v184_v22, %v184_v22  ;;  %v404_v34 = vld [vmem:[%s737_s4] ss:$0 sm:$0xff] }
  0x3f   :  { %430 = vmatprep.subr.bf16.mxu0 %v598_v0  ;;  %450 = vmatprep.subr.bf16.mxu1 %v598_v0  ;;  %v406_v62 = vld [vmem:[%s738_s5] ss:$0 sm:$0xff]  ;;  %p571_p0 = pnand %p570_p13, %p564_p10 }
  0x40   :  { %v191_v27 = vrot.slane %v186_v23, %v190_v24 }
  0x42   :  { %431 = vmatpush3.bf16.msra.mxu0 %v479_v3  ;;  %451 = vmatpush3.bf16.msra.mxu1 %v487_v8 }
  0x43   :  { %432 = vmatprep.subr.bf16.mxu0 %v598_v0  ;;  %452 = vmatprep.subr.bf16.mxu1 %v598_v0 }
  0x46   :  { %433 = vmatpush3.bf16.msra.mxu0 %v480_v5  ;;  %453 = vmatpush3.bf16.msra.mxu1 %v488_v10 }
  0x47   :  { %434 = vmatprep.subr.bf16.mxu0 %v598_v0  ;;  %454 = vmatprep.subr.bf16.mxu1 %v598_v0 }
  0x4a   :  { %435 = vmatpush3.bf16.msra.mxu0 %v481_v7  ;;  %455 = vmatpush3.bf16.msra.mxu1 %v489_v12 }
  0x4b   :  { %436 = vmatprep.subr.bf16.mxu0 %v598_v0  ;;  %456 = vmatprep.subr.bf16.mxu1 %v598_v0 }
  0x4e   :  { %437 = vmatpush3.bf16.msra.mxu0 %v482_v9  ;;  %457 = vmatpush3.bf16.msra.mxu1 %v490_v16 }
  0x4f   :  { %438 = vmatprep.subr.bf16.mxu0 %v598_v0  ;;  %458 = vmatprep.subr.bf16.mxu1 %v598_v0 }
  0x52   :  { %439 = vmatpush3.bf16.msra.mxu0 %v483_v11  ;;  %459 = vmatpush3.bf16.msra.mxu1 %v491_v18 }
  0x53   :  { %440 = vmatprep.subr.bf16.mxu0 %v598_v0  ;;  %460 = vmatprep.subr.bf16.mxu1 %v598_v0  ;;  %v407_v0 = vld [vmem:[%s739_s6] ss:$0 sm:$0xff] }
  0x56   :  { %441 = vmatpush3.bf16.msra.mxu0 %v484_v13  ;;  %461 = vmatpush3.bf16.msra.mxu1 %v492_v19 }
  0x59   :  { %443 = vmatmul.mubr.bf16.vlgmr.msra.gmra.mrb[0].mxu0 %v77_v17 }
 0x12c   :  { %v176_v25 = vpop.f32.mrb[0].mxu0 }
 0x12d   :  { %v444_v26 = vpop.f32.mrb[1].mxu0 }
 0x12e   :  { %v179_v28 = vpop.f32.mrb[2].mxu0 }
 0x12f   :  { %v183_v29 = vpack.c.bf16 %v179_v28, %v176_v25  ;;  %v445_v30 = vpop.f32.mrb[3].mxu0 }
 0x131   :  { %v192_v31 = vadd.bf16 %v191_v27, %v183_v29 }
 0x133   :  { %v193_v33 = vmax.bf16 %v600_v32, %v192_v31 }
 0x135   :  { %463 = vmatmul.mubr.bf16.vlgmr.msra.gmra.mrb[0].mxu1 %v193_v33 }
 0x208   :  { %v294_v35 = vpop.f32.mrb[0].mxu1 }
 0x209   :  { %v317_v36 = vadd.f32 %v404_v34, %v294_v35  ;;  %v464_v37 = vpop.f32.mrb[1].mxu1 }
 0x20a   :  { %v297_v38 = vpop.f32.mrb[2].mxu1 }
 0x20b   :  { %v318_v39 = vadd.f32 %v404_v34, %v297_v38  ;;  %v465_v40 = vpop.f32.mrb[3].mxu1  ;;  %v319_v41 = vadd.f32 %v317_v36, %v75_v14 }
 0x20d   :  { %321 = vadd.xlane.f32.xlu0 %v319_v41  ;;  %v320_v42 = vadd.f32 %v318_v39, %v76_v15 }
 0x211   :  { %323 = vadd.xlane.f32.xlu0 %v320_v42 }
 0x29a   :  { %v322_v45 = vpop.xlane.xlu0 %321 }
 0x29b   :  { %v325_v46 = vmul.f32 0.03125, %v322_v45 }
 0x29d   :  { %v332_v47 = vmul.f32 %v405_v44, %v325_v46 }
 0x29e   :  { %v324_v48 = vpop.xlane.xlu0 %323 }
 0x29f   :  { %v326_v49 = vmul.f32 0.03125, %v324_v48  ;;  %v334_v50 = vsub.f32 %v319_v41, %v332_v47 }
 0x2a1   :  { %v333_v51 = vmul.f32 %v405_v44, %v326_v49  ;;  %v336_v52 = vmul.f32 %v334_v50, %v334_v50 }
 0x2a3   :  { %338 = vadd.xlane.f32.xlu1 %v336_v52  ;;  %v335_v53 = vsub.f32 %v320_v42, %v333_v51 }
 0x2a5   :  { %v337_v54 = vmul.f32 %v335_v53, %v335_v53 }
 0x2a7   :  { %340 = vadd.xlane.f32.xlu1 %v337_v54 }
 0x330   :  { %v339_v55 = vpop.xlane.xlu1 %338 }
 0x331   :  { %v342_v56 = vmul.f32 0.03125, %v339_v55 }
 0x333   :  { %v344_v57 = vadd.f32 1e-06, %v342_v56 }
 0x334   :  { %v341_v58 = vpop.xlane.xlu1 %340 }
 0x335   :  { %493 = vrsqrt.f32 %v344_v57  ;;  %v343_v59 = vmul.f32 0.03125, %v341_v58 }
 0x337   :  { %v345_v60 = vadd.f32 1e-06, %v343_v59 }
 0x339   :  { %495 = vrsqrt.f32 %v345_v60 }
 0x33f   :  { %v494_v61 = vpop.eup %493 }
 0x340   :  { %v348_v63 = vmul.f32 %v494_v61, %v334_v50 }
 0x342   :  { %v357_v1 = vmul.f32 %v406_v62, %v348_v63 }
 0x343   :  { %v496_v2 = vpop.eup %495 }
 0x344   :  { %v349_v3 = vmul.f32 %v496_v2, %v335_v53  ;;  %v366_v4 = vadd.f32 %v407_v0, %v357_v1 }
 0x346   :  { %v358_v5 = vmul.f32 %v406_v62, %v349_v3  ;;  %368 = vst [vmem:[#allocation9] sm:$0xff] %v366_v4 }
 0x348   :  { %v367_v6 = vadd.f32 %v407_v0, %v358_v5 }
 0x34a   :  { %369 = vst [vmem:[#allocation9 + $0x8] sm:$0xff] %v367_v6 }
 0x34b   :  { %574 = shalt.err (!%p571_p0)
}
 0x34c   :  { %s575_s24 = scalar_lea.hbm %s740_s7, 256 }
 0x34d   :  { %p576_p1 = scmp.ne.s32.totalorder %s740_s7, %s575_s24  ;;  %p579_p2 = scmp.lt.u32.totalorder %s575_s24, %s740_s7 }
 0x34f   :  { %p581_p3 = pnand %p579_p2, %p576_p1 }
 0x351   :  { %584 = shalt.err (!%p581_p3)
}
 0x352   :  { %381 = dma.vmem_to_hbm [thread:$0]  %s376_s22, 256, %s740_s7, [#allocation5], %s595_s1, %s595_s1, %s596_s25  }
 0x353   :  { %589 = dma.done.wait [#allocation5], 256  }
 0x354   :  { %590 = vsyncadd [#allocation5], 4294967040 }
 0x355   :  { %385 = vsyncpa [#allocation4], 1 }
 0x356   :  { %386 = vsyncpa [#allocation7], 1 }
 0x357   :  { %387 = vsyncpa [#allocation5], 1 }

</bundles_post_ra>
